<compile_context>
chip_gen: v5e
topology: v5e:2x2
jax: 0.10.0
libtpu: 0.0.40
codegen_flags: <defaults>
</compile_context>

<pallas_src>
import numpy as np
import jax
import jax.numpy as jnp
from jax.experimental import pallas as pl
from jax.experimental.pallas import tpu as pltpu


def _linear_rnn_kernel(bs_ref, x_ref, w_ih_t_ref, w_hh_t_ref, b_ref, h_ref):
    """Whole packed-sequence recurrence in one kernel invocation.

    bs_ref     : SMEM (T,) int32    batch_sizes (scalar prefetch)
    x_ref      : VMEM (T*Bp, Din)   zero-padded inputs, flattened over time
    w_ih_t_ref : VMEM (Din, H)      W_ih^T
    w_hh_t_ref : VMEM (H, H)        W_hh^T
    b_ref      : VMEM (1, H)        b_ih + b_hh
    h_ref      : VMEM (Bp, H) (out) final hidden state (single writeback)
    """
    T = bs_ref.shape[0]
    TB, _ = x_ref.shape
    Bp = TB // T
    H = w_hh_t_ref.shape[-1]

    # (1) Input projection hoisted OFF the serial chain: one batched MXU matmul
    #     covering every timestep, biases folded in once.
    x_proj = (jnp.dot(x_ref[...], w_ih_t_ref[...],
                      preferred_element_type=jnp.float32) + b_ref[...])

    # (2) Row-index column built ONCE (hoisted out of the time loop).
    row = jax.lax.broadcasted_iota(jnp.int32, (Bp, 1), 0)

    # (3) Serial recurrence: only a tiny (Bp,H)@(H,H) matmul + select per step.
    #     T is static and small -> fully unrolled; hidden stays in vregs, so there
    #     are zero per-step VMEM stores.
    # TODO(synk): for large T, switch to lax.fori_loop over a VMEM-staged x_proj
    #             (and chunk the time axis for v7x's 64 MiB VMEM).
    w_hh_t = w_hh_t_ref[...]
    h = jnp.zeros((Bp, H), jnp.float32)
    for t in range(T):
        new_h = x_proj[t * Bp:(t + 1) * Bp, :] + jnp.dot(
            h, w_hh_t, preferred_element_type=jnp.float32)
        # Only the first batch_sizes[t] (length-sorted) rows advance this step.
        h = jnp.where(row < bs_ref[t], new_h, h)

    h_ref[...] = h  # single final writeback


def linear_rnn_pallas(x_flat, batch_sizes, w_ih_t, w_hh_t, bias):
    """x_flat: (T*Bp, Din) zero-padded packed input -> final hidden (Bp, H)."""
    TB, Din = x_flat.shape
    T = batch_sizes.shape[0]
    Bp = TB // T
    H = w_hh_t.shape[-1]

    grid_spec = pltpu.PrefetchScalarGridSpec(
        num_scalar_prefetch=1,
        grid=(1,),  # single invocation; the time loop is inside the kernel
        in_specs=[
            pl.BlockSpec((TB, Din), lambda i, bs: (0, 0)),   # x (resident)
            pl.BlockSpec((Din, H), lambda i, bs: (0, 0)),    # W_ih^T (resident)
            pl.BlockSpec((H, H), lambda i, bs: (0, 0)),      # W_hh^T (resident)
            pl.BlockSpec((1, H), lambda i, bs: (0, 0)),      # bias (resident)
        ],
        out_specs=pl.BlockSpec((Bp, H), lambda i, bs: (0, 0)),
    )
    return pl.pallas_call(
        _linear_rnn_kernel,
        out_shape=jax.ShapeDtypeStruct((Bp, H), jnp.float32),
        grid_spec=grid_spec,
        compiler_params=pltpu.CompilerParams(
            dimension_semantics=("arbitrary",)),
    )(batch_sizes, x_flat, w_ih_t, w_hh_t, bias)


def pack_to_padded_flat(data, batch_sizes_np, b_pad):
    """Packed (sum(bs), Din) data -> zero-padded dense (T*b_pad, Din)."""
    T = int(batch_sizes_np.shape[0])
    t_idx = np.repeat(np.arange(T), batch_sizes_np)
    b_idx = np.concatenate([np.arange(int(s)) for s in batch_sizes_np])
    padded = jnp.zeros((T, b_pad, data.shape[-1]), data.dtype)
    padded = padded.at[t_idx, b_idx].set(data)
    return padded.reshape(T * b_pad, data.shape[-1])


class LinearRNNPallas:
    """JAX/Pallas re-implementation of the PyTorch LinearRNN module."""

    def __init__(self, input_size, hidden_size, num_layers=1, key=None):
        del num_layers  # the PyTorch module also ignores it (single ih/hh pair)
        self.input_size = input_size
        self.hidden_size = hidden_size
        if key is None:
            key = jax.random.PRNGKey(0)
        k1, k2, k3, k4 = jax.random.split(key, 4)
        # nn.Linear init: U(-1/sqrt(fan_in), 1/sqrt(fan_in)).
        bi = 1.0 / np.sqrt(input_size)
        bh = 1.0 / np.sqrt(hidden_size)
        self.w_ih = jax.random.uniform(k1, (hidden_size, input_size),
                                       jnp.float32, -bi, bi)
        self.b_ih = jax.random.uniform(k2, (hidden_size,), jnp.float32, -bi, bi)
        self.w_hh = jax.random.uniform(k3, (hidden_size, hidden_size),
                                       jnp.float32, -bh, bh)
        self.b_hh = jax.random.uniform(k4, (hidden_size,), jnp.float32, -bh, bh)
        # Weight prep hoisted to __init__ (done once, not per forward):
        #   step = x @ W_ih^T + h @ W_hh^T + (b_ih + b_hh)
        self.w_ih_t = self.w_ih.T                         # (Din, H)
        self.w_hh_t = self.w_hh.T                         # (H, H)
        self.bias = (self.b_ih + self.b_hh).reshape(1, hidden_size)

    def forward(self, input_pack):
        data, batch_sizes, _, unsort_idxs = input_pack
        bs_np = np.asarray(batch_sizes)          # host-side (CPU tensor in torch)
        B = int(bs_np[0])
        # pack_padded_sequence guarantees non-increasing batch_sizes.
        assert np.all(np.diff(bs_np) <= 0), "batch_sizes must be non-increasing"
        b_pad = -(-B // 8) * 8                   # sublane-align the batch rows
        x_flat = pack_to_padded_flat(data, bs_np, b_pad)
        hidden = linear_rnn_pallas(
            x_flat, jnp.asarray(bs_np, jnp.int32),
            self.w_ih_t, self.w_hh_t, self.bias)
        hidden = hidden[:B][jnp.asarray(unsort_idxs)]   # drop pad rows, unsort
        return (None, hidden[None])


def _reference_forward(data, batch_sizes_np, unsort_idxs,
                       w_ih, b_ih, w_hh, b_hh, hidden_size):
    """Pure-JAX transliteration of the PyTorch packed-sequence loop."""
    hidden = jnp.zeros((int(batch_sizes_np[0]), hidden_size), jnp.float32)
    off = 0
    for size in batch_sizes_np:
        size = int(size)
        b = data[off:off + size]
        off += size
        chunk = b @ w_ih.T + b_ih + hidden[:size] @ w_hh.T + b_hh
        hidden = jnp.concatenate([chunk, hidden[size:]], axis=0)
    return hidden[np.asarray(unsort_idxs)]


if __name__ == "__main__":
    input_size, hidden_size = 16, 32
    lengths = np.array([5, 8, 3, 6])          # original (unsorted) batch order
    B = len(lengths)
    max_len = int(lengths.max())

    key = jax.random.PRNGKey(0)
    k_model, k_data = jax.random.split(key)
    model = LinearRNNPallas(input_size, hidden_size, num_layers=1, key=k_model)

    seqs = jax.random.normal(k_data, (B, max_len, input_size), jnp.float32)

    # Build the PackedSequence-style tuple, matching
    # torch.nn.utils.rnn.pack_padded_sequence(..., enforce_sorted=False).
    sorted_idxs = np.argsort(-lengths, kind="stable")
    unsort_idxs = np.argsort(sorted_idxs, kind="stable")
    sorted_lengths = lengths[sorted_idxs]
    T = int(sorted_lengths[0])
    batch_sizes = np.array([(sorted_lengths > t).sum() for t in range(T)],
                           np.int64)
    rows = [seqs[sorted_idxs[j], t]
            for t in range(T) for j in range(int(batch_sizes[t]))]
    data = jnp.stack(rows, axis=0)             # (sum(batch_sizes), Din) = (22, 16)

    input_pack = (data, batch_sizes, sorted_idxs, unsort_idxs)
    _, hidden = model.forward(input_pack)
    hidden = jax.block_until_ready(hidden)

    ref = _reference_forward(data, batch_sizes, unsort_idxs,
                             model.w_ih, model.b_ih, model.w_hh, model.b_hh,
                             hidden_size)
    assert hidden.shape == (1, B, hidden_size)
    assert jnp.allclose(hidden[0], ref, atol=1e-4, rtol=1e-4), (
        "max abs err = %g" % float(jnp.max(jnp.abs(hidden[0] - ref))))

    print("KERNEL_OK")
</pallas_src>

<mosaic_0001>
module attributes {stable_mosaic.version = 11 : i64} {
  func.func @_linear_rnn_kernel(%arg0: i32, %arg1: memref<8xi32, #tpu.memory_space<smem>>, %arg2: memref<64x16xf32, #tpu.memory_space<vmem>>, %arg3: memref<16x32xf32, #tpu.memory_space<vmem>>, %arg4: memref<32x32xf32, #tpu.memory_space<vmem>>, %arg5: memref<1x32xf32, #tpu.memory_space<vmem>>, %arg6: memref<8x32xf32, #tpu.memory_space<vmem>>) attributes {dimension_semantics = [#tpu.dimension_semantics<arbitrary>], iteration_bounds = array<i64: 1>, scalar_prefetch = 1 : i64, scratch_operands = 0 : i64, tpu.core_type = #tpu.core_type<tc>, window_params = [{pipeline_mode = #tpu.pipeline_mode<synchronous>, transform_indices = @transform_0, window_bounds = array<i64: 64, 16>}, {pipeline_mode = #tpu.pipeline_mode<synchronous>, transform_indices = @transform_1, window_bounds = array<i64: 16, 32>}, {pipeline_mode = #tpu.pipeline_mode<synchronous>, transform_indices = @transform_2, window_bounds = array<i64: 32, 32>}, {pipeline_mode = #tpu.pipeline_mode<synchronous>, transform_indices = @transform_3, window_bounds = array<i64: 1, 32>}, {pipeline_mode = #tpu.pipeline_mode<synchronous>, transform_indices = @transform_4, window_bounds = array<i64: 8, 32>}]} {
    %c0 = arith.constant 0 : index
    %c0_0 = arith.constant 0 : index
    %0 = vector.load %arg2[%c0, %c0_0] : memref<64x16xf32, #tpu.memory_space<vmem>>, vector<64x16xf32>
    %c0_1 = arith.constant 0 : index
    %c0_2 = arith.constant 0 : index
    %1 = vector.load %arg3[%c0_1, %c0_2] : memref<16x32xf32, #tpu.memory_space<vmem>>, vector<16x32xf32>
    %cst = arith.constant dense<0.000000e+00> : vector<64x32xf32>
    %2 = tpu.matmul %0, %1, %cst {dimension_numbers = #tpu.dot_dimension_numbers<[1], [0], [0], [1], [0, 0, 1, 1], [], []>} : vector<64x16xf32>, vector<16x32xf32>, vector<64x32xf32> -> vector<64x32xf32>
    %c0_3 = arith.constant 0 : index
    %c0_4 = arith.constant 0 : index
    %3 = vector.load %arg5[%c0_3, %c0_4] : memref<1x32xf32, #tpu.memory_space<vmem>>, vector<1x32xf32>
    %4 = vector.broadcast %3 : vector<1x32xf32> to vector<64x32xf32>
    %5 = arith.addf %2, %4 : vector<64x32xf32>
    %6 = tpu.iota {dimensions = array<i32: 0>} : vector<8x1xi32>
    %c0_5 = arith.constant 0 : index
    %c0_6 = arith.constant 0 : index
    %7 = vector.load %arg4[%c0_5, %c0_6] : memref<32x32xf32, #tpu.memory_space<vmem>>, vector<32x32xf32>
    %cst_7 = arith.constant 0.000000e+00 : f32
    %8 = vector.broadcast %cst_7 : f32 to vector<8x32xf32>
    %9 = vector.extract_strided_slice %5 {offsets = [0, 0], sizes = [8, 32], strides = [1, 1]} : vector<64x32xf32> to vector<8x32xf32>
    %cst_8 = arith.constant dense<0.000000e+00> : vector<8x32xf32>
    %10 = tpu.matmul %8, %7, %cst_8 {dimension_numbers = #tpu.dot_dimension_numbers<[1], [0], [0], [1], [0, 0, 1, 1], [], []>} : vector<8x32xf32>, vector<32x32xf32>, vector<8x32xf32> -> vector<8x32xf32>
    %11 = arith.addf %9, %10 : vector<8x32xf32>
    %c0_9 = arith.constant 0 : index
    %12 = memref.load %arg1[%c0_9] : memref<8xi32, #tpu.memory_space<smem>>
    %13 = vector.broadcast %12 : i32 to vector<8x1xi32>
    %14 = arith.cmpi slt, %6, %13 : vector<8x1xi32>
    %15 = vector.shape_cast %14 : vector<8x1xi1> to vector<8x1xi1>
    %16 = vector.broadcast %15 : vector<8x1xi1> to vector<8x32xi1>
    %17 = arith.select %16, %11, %8 : vector<8x32xi1>, vector<8x32xf32>
    %18 = vector.extract_strided_slice %5 {offsets = [8, 0], sizes = [8, 32], strides = [1, 1]} : vector<64x32xf32> to vector<8x32xf32>
    %cst_10 = arith.constant dense<0.000000e+00> : vector<8x32xf32>
    %19 = tpu.matmul %17, %7, %cst_10 {dimension_numbers = #tpu.dot_dimension_numbers<[1], [0], [0], [1], [0, 0, 1, 1], [], []>} : vector<8x32xf32>, vector<32x32xf32>, vector<8x32xf32> -> vector<8x32xf32>
    %20 = arith.addf %18, %19 : vector<8x32xf32>
    %c1 = arith.constant 1 : index
    %21 = memref.load %arg1[%c1] : memref<8xi32, #tpu.memory_space<smem>>
    %22 = vector.broadcast %21 : i32 to vector<8x1xi32>
    %23 = arith.cmpi slt, %6, %22 : vector<8x1xi32>
    %24 = vector.shape_cast %23 : vector<8x1xi1> to vector<8x1xi1>
    %25 = vector.broadcast %24 : vector<8x1xi1> to vector<8x32xi1>
    %26 = arith.select %25, %20, %17 : vector<8x32xi1>, vector<8x32xf32>
    %27 = vector.extract_strided_slice %5 {offsets = [16, 0], sizes = [8, 32], strides = [1, 1]} : vector<64x32xf32> to vector<8x32xf32>
    %cst_11 = arith.constant dense<0.000000e+00> : vector<8x32xf32>
    %28 = tpu.matmul %26, %7, %cst_11 {dimension_numbers = #tpu.dot_dimension_numbers<[1], [0], [0], [1], [0, 0, 1, 1], [], []>} : vector<8x32xf32>, vector<32x32xf32>, vector<8x32xf32> -> vector<8x32xf32>
    %29 = arith.addf %27, %28 : vector<8x32xf32>
    %c2 = arith.constant 2 : index
    %30 = memref.load %arg1[%c2] : memref<8xi32, #tpu.memory_space<smem>>
    %31 = vector.broadcast %30 : i32 to vector<8x1xi32>
    %32 = arith.cmpi slt, %6, %31 : vector<8x1xi32>
    %33 = vector.shape_cast %32 : vector<8x1xi1> to vector<8x1xi1>
    %34 = vector.broadcast %33 : vector<8x1xi1> to vector<8x32xi1>
    %35 = arith.select %34, %29, %26 : vector<8x32xi1>, vector<8x32xf32>
    %36 = vector.extract_strided_slice %5 {offsets = [24, 0], sizes = [8, 32], strides = [1, 1]} : vector<64x32xf32> to vector<8x32xf32>
    %cst_12 = arith.constant dense<0.000000e+00> : vector<8x32xf32>
    %37 = tpu.matmul %35, %7, %cst_12 {dimension_numbers = #tpu.dot_dimension_numbers<[1], [0], [0], [1], [0, 0, 1, 1], [], []>} : vector<8x32xf32>, vector<32x32xf32>, vector<8x32xf32> -> vector<8x32xf32>
    %38 = arith.addf %36, %37 : vector<8x32xf32>
    %c3 = arith.constant 3 : index
    %39 = memref.load %arg1[%c3] : memref<8xi32, #tpu.memory_space<smem>>
    %40 = vector.broadcast %39 : i32 to vector<8x1xi32>
    %41 = arith.cmpi slt, %6, %40 : vector<8x1xi32>
    %42 = vector.shape_cast %41 : vector<8x1xi1> to vector<8x1xi1>
    %43 = vector.broadcast %42 : vector<8x1xi1> to vector<8x32xi1>
    %44 = arith.select %43, %38, %35 : vector<8x32xi1>, vector<8x32xf32>
    %45 = vector.extract_strided_slice %5 {offsets = [32, 0], sizes = [8, 32], strides = [1, 1]} : vector<64x32xf32> to vector<8x32xf32>
    %cst_13 = arith.constant dense<0.000000e+00> : vector<8x32xf32>
    %46 = tpu.matmul %44, %7, %cst_13 {dimension_numbers = #tpu.dot_dimension_numbers<[1], [0], [0], [1], [0, 0, 1, 1], [], []>} : vector<8x32xf32>, vector<32x32xf32>, vector<8x32xf32> -> vector<8x32xf32>
    %47 = arith.addf %45, %46 : vector<8x32xf32>
    %c4 = arith.constant 4 : index
    %48 = memref.load %arg1[%c4] : memref<8xi32, #tpu.memory_space<smem>>
    %49 = vector.broadcast %48 : i32 to vector<8x1xi32>
    %50 = arith.cmpi slt, %6, %49 : vector<8x1xi32>
    %51 = vector.shape_cast %50 : vector<8x1xi1> to vector<8x1xi1>
    %52 = vector.broadcast %51 : vector<8x1xi1> to vector<8x32xi1>
    %53 = arith.select %52, %47, %44 : vector<8x32xi1>, vector<8x32xf32>
    %54 = vector.extract_strided_slice %5 {offsets = [40, 0], sizes = [8, 32], strides = [1, 1]} : vector<64x32xf32> to vector<8x32xf32>
    %cst_14 = arith.constant dense<0.000000e+00> : vector<8x32xf32>
    %55 = tpu.matmul %53, %7, %cst_14 {dimension_numbers = #tpu.dot_dimension_numbers<[1], [0], [0], [1], [0, 0, 1, 1], [], []>} : vector<8x32xf32>, vector<32x32xf32>, vector<8x32xf32> -> vector<8x32xf32>
    %56 = arith.addf %54, %55 : vector<8x32xf32>
    %c5 = arith.constant 5 : index
    %57 = memref.load %arg1[%c5] : memref<8xi32, #tpu.memory_space<smem>>
    %58 = vector.broadcast %57 : i32 to vector<8x1xi32>
    %59 = arith.cmpi slt, %6, %58 : vector<8x1xi32>
    %60 = vector.shape_cast %59 : vector<8x1xi1> to vector<8x1xi1>
    %61 = vector.broadcast %60 : vector<8x1xi1> to vector<8x32xi1>
    %62 = arith.select %61, %56, %53 : vector<8x32xi1>, vector<8x32xf32>
    %63 = vector.extract_strided_slice %5 {offsets = [48, 0], sizes = [8, 32], strides = [1, 1]} : vector<64x32xf32> to vector<8x32xf32>
    %cst_15 = arith.constant dense<0.000000e+00> : vector<8x32xf32>
    %64 = tpu.matmul %62, %7, %cst_15 {dimension_numbers = #tpu.dot_dimension_numbers<[1], [0], [0], [1], [0, 0, 1, 1], [], []>} : vector<8x32xf32>, vector<32x32xf32>, vector<8x32xf32> -> vector<8x32xf32>
    %65 = arith.addf %63, %64 : vector<8x32xf32>
    %c6 = arith.constant 6 : index
    %66 = memref.load %arg1[%c6] : memref<8xi32, #tpu.memory_space<smem>>
    %67 = vector.broadcast %66 : i32 to vector<8x1xi32>
    %68 = arith.cmpi slt, %6, %67 : vector<8x1xi32>
    %69 = vector.shape_cast %68 : vector<8x1xi1> to vector<8x1xi1>
    %70 = vector.broadcast %69 : vector<8x1xi1> to vector<8x32xi1>
    %71 = arith.select %70, %65, %62 : vector<8x32xi1>, vector<8x32xf32>
    %72 = vector.extract_strided_slice %5 {offsets = [56, 0], sizes = [8, 32], strides = [1, 1]} : vector<64x32xf32> to vector<8x32xf32>
    %cst_16 = arith.constant dense<0.000000e+00> : vector<8x32xf32>
    %73 = tpu.matmul %71, %7, %cst_16 {dimension_numbers = #tpu.dot_dimension_numbers<[1], [0], [0], [1], [0, 0, 1, 1], [], []>} : vector<8x32xf32>, vector<32x32xf32>, vector<8x32xf32> -> vector<8x32xf32>
    %74 = arith.addf %72, %73 : vector<8x32xf32>
    %c7 = arith.constant 7 : index
    %75 = memref.load %arg1[%c7] : memref<8xi32, #tpu.memory_space<smem>>
    %76 = vector.broadcast %75 : i32 to vector<8x1xi32>
    %77 = arith.cmpi slt, %6, %76 : vector<8x1xi32>
    %78 = vector.shape_cast %77 : vector<8x1xi1> to vector<8x1xi1>
    %79 = vector.broadcast %78 : vector<8x1xi1> to vector<8x32xi1>
    %80 = arith.select %79, %74, %71 : vector<8x32xi1>, vector<8x32xf32>
    %c0_17 = arith.constant 0 : index
    %c0_18 = arith.constant 0 : index
    %81 = vector.load %arg6[%c0_17, %c0_18] : memref<8x32xf32, #tpu.memory_space<vmem>>, vector<8x32xf32>
    tpu.vector_store %arg6[%c0_17, %c0_18], %80 {strides = array<i32>} : memref<8x32xf32, #tpu.memory_space<vmem>>, vector<8x32xf32>,
    return
  }
  func.func @transform_0(%arg0: i32, %arg1: memref<8xi32, #tpu.memory_space<smem>>) -> (i32, i32) {
    %c0_i32 = arith.constant 0 : i32
    %c0_i32_0 = arith.constant 0 : i32
    %c0_i32_1 = arith.constant 0 : i32
    return %c0_i32, %c0_i32_0 : i32, i32
  }
  func.func @transform_1(%arg0: i32, %arg1: memref<8xi32, #tpu.memory_space<smem>>) -> (i32, i32) {
    %c0_i32 = arith.constant 0 : i32
    %c0_i32_0 = arith.constant 0 : i32
    %c0_i32_1 = arith.constant 0 : i32
    return %c0_i32, %c0_i32_0 : i32, i32
  }
  func.func @transform_2(%arg0: i32, %arg1: memref<8xi32, #tpu.memory_space<smem>>) -> (i32, i32) {
    %c0_i32 = arith.constant 0 : i32
    %c0_i32_0 = arith.constant 0 : i32
    %c0_i32_1 = arith.constant 0 : i32
    return %c0_i32, %c0_i32_0 : i32, i32
  }
  func.func @transform_3(%arg0: i32, %arg1: memref<8xi32, #tpu.memory_space<smem>>) -> (i32, i32) {
    %c0_i32 = arith.constant 0 : i32
    %c0_i32_0 = arith.constant 0 : i32
    %c0_i32_1 = arith.constant 0 : i32
    return %c0_i32, %c0_i32_0 : i32, i32
  }
  func.func @transform_4(%arg0: i32, %arg1: memref<8xi32, #tpu.memory_space<smem>>) -> (i32, i32) {
    %c0_i32 = arith.constant 0 : i32
    %c0_i32_0 = arith.constant 0 : i32
    %c0_i32_1 = arith.constant 0 : i32
    return %c0_i32, %c0_i32_0 : i32, i32
  }
}

</mosaic_0001>

<bundles_post_ra>
// kernel: tpu_custom_call.1
= control target key start
LH: loop header
LB: loop body
LE: loop exit
PB: predicated region body
PF: predicated region fallthrough
CT: control target
= control target key end

     0   :  { %s439_s21 = smov [#allocation3]   ;;  %s579_s0 = inlined_call_operand.vmem [shape: s32[8], index: 0, kind: input, shape index: {}]   ;;  %s580_s1 = inlined_call_operand.vmem [shape: f32[64,16], index: 1, kind: input, shape index: {}]   ;;  %s581_s2 = inlined_call_operand.vmem [shape: f32[16,32], index: 2, kind: input, shape index: {}]   ;;  %s582_s3 = inlined_call_operand.vmem [shape: f32[32,32], index: 3, kind: input, shape index: {}]   ;;  %s583_s4 = inlined_call_operand.vmem [shape: f32[1,32], index: 4, kind: input, shape index: {}]   ;;  %s584_s5 = inlined_call_operand.hbm [shape: f32[8,32], index: 5, kind: output, shape index: {}]  }
   0x1   :  { %s11_s20 = sshll.u32 %s579_s0, 4  ;;  %s12_s20 = int_to_ptr.vmem [resolvable:$true] %s11_s20 }
   0x2   :  { %14 = dma.vmem_to_smem %s12_s20, 16, %s439_s21, [#allocation2] }
   0x3   :  { %435 = dma.done.wait [#allocation2], 16 }
   0x4   :  { %436 = vsyncadd [#allocation2], 4294967280 }
   0x5   :  { %17 = sfence }
   0x6   :  { %v478_v0 = vld [vmem:[%s582_s3 + $0x18] sm:$0xff]  ;;  %v36_v1 = vld [vmem:[%s581_s2 + $0x8] sm:$0xff]  ;;  %v486_v2 = vld [vmem:[%s582_s3 + $0x10] sm:$0xff]  ;;  %vm41_vm0 = vcmask 130048  }
   0x7   :  { %129 = vmatpush.msra.mxu1 %v478_v0  ;;  %80 = vmatpush.msra.mxu0 %v36_v1  ;;  %v35_v3 = vld [vmem:[%s581_s2] sm:$0xff]  ;;  %v110_v5 = vld [vmem:[%s582_s3 + $0x8] sm:$0xff] }
   0x8   :  { %v27_v4 = vld [vmem:[%s580_s1] sm:$0xff]  ;;  %159 = vmatpush.msra.mxu2 %v478_v0  ;;  %393 = vmatpush.msra.mxu3 %v36_v1 }
   0x9   :  { %130 = vmatpush.msra.mxu1 %v486_v2  ;;  %81 = vmatpush.msra.mxu0 %v35_v3 }
   0xa   :  { %18 = vsyncpa [#allocation5], 0  ;;  %371 = vmatmul.msk.f32.vlgmr.msra.gmra.mxu0 %vm41_vm0, %v27_v4  ;;  %v109_v6 = vld [vmem:[%s582_s3] sm:$0xff]  ;;  %160 = vmatpush.msra.mxu2 %v486_v2  ;;  %v440_v7 = vmov 0.0   ;;  %v28_v8 = vld [vmem:[%s580_s1 + $0x8] sm:$0xff]  ;;  %s138_s16 = sld [smem:[#allocation3]]  ;;  %v107_v12 = vlaneseq }
   0xb   :  { %131 = vmatpush.msra.mxu1 %v110_v5  ;;  %394 = vmatpush.msra.mxu3 %v35_v3  ;;  %v32_v9 = vld [vmem:[%s580_s1 + $0x28] sm:$0xff]  ;;  %v33_v10 = vld [vmem:[%s580_s1 + $0x30] sm:$0xff]  ;;  %v34_v11 = vld [vmem:[%s580_s1 + $0x38] sm:$0xff]  ;;  %vm113_vm2 = vcmask 261120   ;;  %s380_s20 = sld [smem:[#allocation3 + $0x1]]  ;;  %s441_s29 = smov [#allocation4]  }
   0xc   :  { %161 = vmatpush.msra.mxu2 %v110_v5  ;;  %376 = vmatmul.msk.f32.vlgmr.msra.gmra.mxu3 %vm41_vm0, %v32_v9  ;;  %v534_v13 = vld [vmem:[%s583_s4] ss:$0 sm:$0xff]  ;;  %v536_v15 = vshrl.u32 %v107_v12, 7  ;;  %v29_v21 = vld [vmem:[%s580_s1 + $0x10] sm:$0xff]  ;;  %v30_v28 = vld [vmem:[%s580_s1 + $0x18] sm:$0xff]  ;;  %s382_s23 = sld [smem:[#allocation3 + $0x2]] }
   0xd   :  { %189 = vmatpush.msrb.mxu3 %v478_v0  ;;  %132 = vmatpush.msra.mxu1 %v109_v6  ;;  %v31_v38 = vld [vmem:[%s580_s1 + $0x20] sm:$0xff]  ;;  %s384_s26 = sld [smem:[#allocation3 + $0x3]]  ;;  %s360_s30 = sshll.u32 %s441_s29, 4  ;;  %s361_s30 = int_to_ptr.vmem [resolvable:$true] %s360_s30 }
   0xe   :  { %133 = vmatmul.f32.vlgmr.msra.gmra.mxu1 %v440_v7  ;;  %162 = vmatpush.msra.mxu2 %v109_v6  ;;  %s386_s27 = sld [smem:[#allocation3 + $0x4]]  ;;  %s362_s8 = sshll.u32 %s584_s5, 4  ;;  %s363_s8 = int_to_ptr.hbm [resolvable:$true] %s362_s8 }
   0xf   :  { %190 = vmatpush.msrb.mxu3 %v486_v2  ;;  %219 = vmatpush.msrb.mxu1 %v478_v0  ;;  %s388_s1 = sld [smem:[#allocation3 + $0x5]] }
  0x10   :  { %249 = vmatpush.msrb.mxu2 %v478_v0  ;;  %v139_v17 = vstv %s138_s16  ;;  %s390_s0 = sld [smem:[#allocation3 + $0x6]] }
  0x11   :  { %191 = vmatpush.msrb.mxu3 %v110_v5  ;;  %220 = vmatpush.msrb.mxu1 %v486_v2  ;;  %vm140_vm1 = vcmp.lt.s32.totalorder %v536_v15, %v139_v17  ;;  %v169_v24 = vstv %s380_s20  ;;  %s392_s28 = sld [smem:[#allocation3 + $0x7]] }
  0x12   :  { %250 = vmatpush.msrb.mxu2 %v486_v2  ;;  %372 = vmatmul.msk.f32.gmra.mxu0 %vm41_vm0, %v28_v8  ;;  %vm170_vm3 = vcmp.lt.s32.totalorder %v536_v15, %v169_v24  ;;  %v199_v34 = vstv %s382_s23 }
  0x13   :  { %192 = vmatpush.msrb.mxu3 %v109_v6  ;;  %221 = vmatpush.msrb.mxu1 %v110_v5  ;;  %vm200_vm4 = vcmp.lt.s32.totalorder %v536_v15, %v199_v34  ;;  %v229_v41 = vstv %s384_s26 }
  0x14   :  { %251 = vmatpush.msrb.mxu2 %v110_v5  ;;  %377 = vmatmul.msk.f32.gmra.mxu3 %vm41_vm0, %v33_v10  ;;  %vm230_vm5 = vcmp.lt.s32.totalorder %v536_v15, %v229_v41  ;;  %v259_v47 = vstv %s386_s27 }
  0x15   :  { %222 = vmatpush.msrb.mxu1 %v109_v6  ;;  %279 = vmatpush.msra.mxu3 %v478_v0  ;;  %vm260_vm6 = vcmp.lt.s32.totalorder %v536_v15, %v259_v47  ;;  %v289_v51 = vstv %s388_s1 }
  0x16   :  { %252 = vmatpush.msrb.mxu2 %v109_v6  ;;  %vm290_vm7 = vcmp.lt.s32.totalorder %v536_v15, %v289_v51  ;;  %v319_v56 = vstv %s390_s0 }
  0x17   :  { %309 = vmatpush.msra.mxu1 %v478_v0  ;;  %280 = vmatpush.msra.mxu3 %v486_v2  ;;  %vm320_vm8 = vcmp.lt.s32.totalorder %v536_v15, %v319_v56  ;;  %v349_v61 = vstv %s392_s28 }
  0x18   :  { %vm350_vm9 = vcmp.lt.s32.totalorder %v536_v15, %v349_v61 }
  0x19   :  { %310 = vmatpush.msra.mxu1 %v486_v2  ;;  %281 = vmatpush.msra.mxu3 %v110_v5 }
  0x1a   :  { %373 = vmatmul.msk.f32.gmra.mxu0 %vm41_vm0, %v29_v21 }
  0x1b   :  { %311 = vmatpush.msra.mxu1 %v110_v5  ;;  %282 = vmatpush.msra.mxu3 %v109_v6 }
  0x1c   :  { %378 = vmatmul.msk.f32.gmra.mxu3 %vm41_vm0, %v34_v11 }
  0x1d   :  { %312 = vmatpush.msra.mxu1 %v109_v6 }
  0x22   :  { %374 = vmatmul.msk.f32.gmra.mxu0 %vm41_vm0, %v30_v28 }
  0x2a   :  { %375 = vmatmul.msk.f32.gmra.mxu0 %vm41_vm0, %v31_v38 }
  0x87   :  { %v83_v14 = vpop.f32.mrf.mxu0 }
  0x88   :  { %v84_v16 = vadd.f32 %v534_v13, %v83_v14 }
  0x8b   :  { %v134_v18 = vpop.f32.mrf.mxu1 }
  0x8c   :  { %v137_v19 = vadd.f32 %v134_v18, %v84_v16 }
  0x8e   :  { %v143_v20 = vsel %vm140_vm1, %v137_v19, 0.0 }
  0x8f   :  { %379 = vmatmul.msk.f32.vlgmr.msra.gmra.mxu2 %vm113_vm2, %v143_v20  ;;  %v86_v22 = vpop.f32.mrf.mxu0  ;;  %v98_v29 = vpop.f32.mrf.mxu3 }
  0x90   :  { %339 = vmatpush.msra.mxu2 %v478_v0  ;;  %v87_v23 = vadd.f32 %v534_v13, %v86_v22  ;;  %v99_v52 = vadd.f32 %v534_v13, %v98_v29 }
  0x92   :  { %340 = vmatpush.msra.mxu2 %v486_v2 }
  0x94   :  { %341 = vmatpush.msra.mxu2 %v110_v5 }
  0x96   :  { %342 = vmatpush.msra.mxu2 %v109_v6 }
  0x97   :  { %v101_v30 = vpop.f32.mrf.mxu3  ;;  %v89_v32 = vpop.f32.mrf.mxu0 }
  0x98   :  { %v90_v33 = vadd.f32 %v534_v13, %v89_v32  ;;  %v102_v57 = vadd.f32 %v534_v13, %v101_v30 }
  0x9f   :  { %v104_v31 = vpop.f32.mrf.mxu3  ;;  %v92_v39 = vpop.f32.mrf.mxu0 }
  0xa0   :  { %v93_v40 = vadd.f32 %v534_v13, %v92_v39  ;;  %v105_v62 = vadd.f32 %v534_v13, %v104_v31 }
  0xa7   :  { %v95_v45 = vpop.f32.mrf.mxu0 }
  0xa8   :  { %v96_v46 = vadd.f32 %v534_v13, %v95_v45 }
 0x112   :  { %v164_v25 = vpop.f32.mrf.mxu2 }
 0x113   :  { %v167_v26 = vadd.f32 %v164_v25, %v87_v23 }
 0x115   :  { %v173_v27 = vsel %vm170_vm3, %v167_v26, %v143_v20 }
 0x116   :  { %381 = vmatmul.msk.f32.vlgmr.msrb.gmra.mxu3 %vm113_vm2, %v173_v27 }
 0x199   :  { %v194_v35 = vpop.f32.mrf.mxu3 }
 0x19a   :  { %v197_v36 = vadd.f32 %v194_v35, %v90_v33 }
 0x19c   :  { %v203_v37 = vsel %vm200_vm4, %v197_v36, %v173_v27 }
 0x19d   :  { %383 = vmatmul.msk.f32.vlgmr.msrb.gmra.mxu1 %vm113_vm2, %v203_v37 }
 0x21a   :  { %v224_v42 = vpop.f32.mrf.mxu1 }
 0x21b   :  { %v227_v43 = vadd.f32 %v224_v42, %v93_v40 }
 0x21d   :  { %v233_v44 = vsel %vm230_vm5, %v227_v43, %v203_v37 }
 0x21e   :  { %385 = vmatmul.msk.f32.vlgmr.msrb.gmra.mxu2 %vm113_vm2, %v233_v44 }
 0x2a1   :  { %v254_v48 = vpop.f32.mrf.mxu2 }
 0x2a2   :  { %v257_v49 = vadd.f32 %v254_v48, %v96_v46 }
 0x2a4   :  { %v263_v50 = vsel %vm260_vm6, %v257_v49, %v233_v44 }
 0x2a5   :  { %387 = vmatmul.msk.f32.vlgmr.msra.gmra.mxu3 %vm113_vm2, %v263_v50 }
 0x328   :  { %v284_v53 = vpop.f32.mrf.mxu3 }
 0x329   :  { %v287_v54 = vadd.f32 %v284_v53, %v99_v52 }
 0x32b   :  { %v293_v55 = vsel %vm290_vm7, %v287_v54, %v263_v50 }
 0x32c   :  { %389 = vmatmul.msk.f32.vlgmr.msra.gmra.mxu1 %vm113_vm2, %v293_v55 }
 0x3a9   :  { %v314_v58 = vpop.f32.mrf.mxu1 }
 0x3aa   :  { %v317_v59 = vadd.f32 %v314_v58, %v102_v57 }
 0x3ac   :  { %v323_v60 = vsel %vm320_vm8, %v317_v59, %v293_v55 }
 0x3ad   :  { %391 = vmatmul.msk.f32.vlgmr.msra.gmra.mxu2 %vm113_vm2, %v323_v60 }
 0x430   :  { %v344_v63 = vpop.f32.mrf.mxu2 }
 0x431   :  { %v347_v0 = vadd.f32 %v344_v63, %v105_v62 }
 0x433   :  { %v353_v1 = vsel %vm350_vm9, %v347_v0, %v323_v60 }
 0x434   :  { %354 = vst.msk [vmem:[#allocation4] sm:$0xff] %vm113_vm2, %v353_v1 }
 0x435   :  { %365 = dma.vmem_to_hbm [thread:$0]  %s361_s30, 128, %s363_s8, [#allocation5]  }
 0x436   :  { %437 = dma.done.wait [#allocation5], 128  }
 0x437   :  { %438 = vsyncadd [#allocation5], 4294967168 }
 0x438   :  { %370 = vsyncpa [#allocation5], 1 }

</bundles_post_ra>
